<compile_context>
chip_gen: v6e
topology: v6e:2x2x1
jax: 0.10.0
libtpu: 0.0.40
codegen_flags: <defaults>
</compile_context>

<pallas_src>
import jax
import jax.numpy as jnp
from jax.experimental import pallas as pl
from jax.experimental.pallas import tpu as pltpu


def linear_vpu_kernel(x_ref, wt_ref, b_ref, o_ref):
    # x_ref: (TB, IN), wt_ref: (IN, OUT) [already transposed], b_ref: (1, OUT),
    # o_ref: (TB, OUT).  Unrolled VPU contraction over the (tiny, static) IN
    # dim, accumulating in float32 regardless of the I/O dtype.
    x = x_ref[...].astype(jnp.float32)
    wt = wt_ref[...].astype(jnp.float32)
    in_features = x_ref.shape[1]

    y = x[:, 0:1] * wt[0:1, :]                     # (TB,1)*(1,OUT) -> (TB,OUT)
    for k in range(1, in_features):                # static unroll (IN == 3)
        y = y + x[:, k:k + 1] * wt[k:k + 1, :]
    y = y + b_ref[...].astype(jnp.float32)         # (1, OUT) broadcast add

    o_ref[...] = y.astype(o_ref.dtype)


def _round_up(n, m):
    return ((n + m - 1) // m) * m


def _linear_small(x, w_t, bias2d):
    """Grid-less path for tiny B: whole operands live in VMEM, one invocation."""
    B, _ = x.shape
    OUT = w_t.shape[1]
    return pl.pallas_call(
        linear_vpu_kernel,
        out_shape=jax.ShapeDtypeStruct((B, OUT), x.dtype),
        in_specs=[
            pl.BlockSpec(memory_space=pltpu.MemorySpace.VMEM),
            pl.BlockSpec(memory_space=pltpu.MemorySpace.VMEM),
            pl.BlockSpec(memory_space=pltpu.MemorySpace.VMEM),
        ],
        out_specs=pl.BlockSpec(memory_space=pltpu.MemorySpace.VMEM),
    )(x, w_t, bias2d)


def _linear_tiled(x, w_t, bias2d, tb):
    """Batch-tiled path: 'parallel' grid axis over batch tiles, ragged tail OK."""
    B, IN = x.shape
    OUT = w_t.shape[1]
    grid = (pl.cdiv(B, tb),)                       # masked ragged last tile
    return pl.pallas_call(
        linear_vpu_kernel,
        out_shape=jax.ShapeDtypeStruct((B, OUT), x.dtype),
        grid=grid,
        in_specs=[
            pl.BlockSpec((tb, IN), lambda i: (i, 0)),
            pl.BlockSpec((IN, OUT), lambda i: (0, 0)),
            pl.BlockSpec((1, OUT), lambda i: (0, 0)),
        ],
        out_specs=pl.BlockSpec((tb, OUT), lambda i: (i, 0)),
        compiler_params=pltpu.CompilerParams(
            dimension_semantics=("parallel",)),
    )(x, w_t, bias2d)


def linear_forward(x, weight, bias, *, batch_tile=4096, small_batch_rows=1024):
    """Pallas-backed equivalent of nn.Linear(3, 3).forward(x).

    x:      (B, IN)   float32
    weight: (OUT, IN) float32  (PyTorch convention)
    bias:   (OUT,)    float32
    returns (B, OUT)  float32
    """
    # Wrapper-side layout plumbing: transpose W once so the kernel consumes the
    # RHS in natural (K, N) layout, and lift bias to 2-D for vreg broadcasting.
    w_t = weight.T                      # (IN, OUT)
    bias2d = bias.reshape(1, -1)        # (1, OUT)

    B = x.shape[0]
    if B <= small_batch_rows:
        # Tiny batch: one grid-less invocation, whole thing << VMEM.
        return _linear_small(x, w_t, bias2d)

    # Large batch: tile the batch dim.  Cap at batch_tile (VMEM budget across
    # v5e/v6e/v7x), but shrink so the parallel grid always has >= 2 steps and
    # both v7x TensorCores get work.  Keep tb a sublane multiple (8).
    tb = min(batch_tile, _round_up(pl.cdiv(B, 2), 8))
    return _linear_tiled(x, w_t, bias2d, tb)


if __name__ == "__main__":
    key = jax.random.PRNGKey(0)
    k_x, k_w, k_b, k_xl = jax.random.split(key, 4)

    B, IN, OUT = 2, 3, 3

    # Deterministic parameter init mimicking nn.Linear's U(-1/sqrt(in), 1/sqrt(in)).
    bound = 1.0 / jnp.sqrt(jnp.float32(IN))
    weight = jax.random.uniform(k_w, (OUT, IN), jnp.float32, -bound, bound)
    bias = jax.random.uniform(k_b, (OUT,), jnp.float32, -bound, bound)

    # Small-batch (grid-less) path — the shape implied by the module's test use.
    x = jax.random.normal(k_x, (B, IN), jnp.float32)
    y = linear_forward(x, weight, bias)
    jax.block_until_ready(y)
    y_ref = x @ weight.T + bias
    assert jnp.allclose(y, y_ref, atol=1e-5), "small-batch mismatch vs reference"

    # Tiled path sanity check: non-divisible batch exercises the cdiv grid and
    # masked ragged tail (previously this fell onto the whole-array VMEM path).
    x_large = jax.random.normal(k_xl, (2050, IN), jnp.float32)
    y_large = linear_forward(x_large, weight, bias)
    jax.block_until_ready(y_large)
    y_large_ref = x_large @ weight.T + bias
    assert jnp.allclose(y_large, y_large_ref, atol=1e-5), "tiled mismatch vs reference"

    print("KERNEL_OK")
</pallas_src>

<mosaic_0001>
module attributes {stable_mosaic.version = 11 : i64} {
  func.func @linear_vpu_kernel(%arg0: memref<2x3xf32, #tpu.memory_space<vmem>>, %arg1: memref<3x3xf32, #tpu.memory_space<vmem>>, %arg2: memref<1x3xf32, #tpu.memory_space<vmem>>, %arg3: memref<2x3xf32, #tpu.memory_space<vmem>>) attributes {dimension_semantics = [], scalar_prefetch = 0 : i64, scratch_operands = 0 : i64, tpu.core_type = #tpu.core_type<tc>} {
    %c0 = arith.constant 0 : index
    %c0_0 = arith.constant 0 : index
    %0 = vector.load %arg0[%c0, %c0_0] : memref<2x3xf32, #tpu.memory_space<vmem>>, vector<2x3xf32>
    %c0_1 = arith.constant 0 : index
    %c0_2 = arith.constant 0 : index
    %1 = vector.load %arg1[%c0_1, %c0_2] : memref<3x3xf32, #tpu.memory_space<vmem>>, vector<3x3xf32>
    %2 = vector.extract_strided_slice %0 {offsets = [0, 0], sizes = [2, 1], strides = [1, 1]} : vector<2x3xf32> to vector<2x1xf32>
    %3 = vector.extract_strided_slice %1 {offsets = [0, 0], sizes = [1, 3], strides = [1, 1]} : vector<3x3xf32> to vector<1x3xf32>
    %4 = vector.broadcast %2 : vector<2x1xf32> to vector<2x3xf32>
    %5 = vector.broadcast %3 : vector<1x3xf32> to vector<2x3xf32>
    %6 = arith.mulf %4, %5 : vector<2x3xf32>
    %7 = vector.extract_strided_slice %0 {offsets = [0, 1], sizes = [2, 1], strides = [1, 1]} : vector<2x3xf32> to vector<2x1xf32>
    %8 = vector.extract_strided_slice %1 {offsets = [1, 0], sizes = [1, 3], strides = [1, 1]} : vector<3x3xf32> to vector<1x3xf32>
    %9 = vector.broadcast %7 : vector<2x1xf32> to vector<2x3xf32>
    %10 = vector.broadcast %8 : vector<1x3xf32> to vector<2x3xf32>
    %11 = arith.mulf %9, %10 : vector<2x3xf32>
    %12 = arith.addf %6, %11 : vector<2x3xf32>
    %13 = vector.extract_strided_slice %0 {offsets = [0, 2], sizes = [2, 1], strides = [1, 1]} : vector<2x3xf32> to vector<2x1xf32>
    %14 = vector.extract_strided_slice %1 {offsets = [2, 0], sizes = [1, 3], strides = [1, 1]} : vector<3x3xf32> to vector<1x3xf32>
    %15 = vector.broadcast %13 : vector<2x1xf32> to vector<2x3xf32>
    %16 = vector.broadcast %14 : vector<1x3xf32> to vector<2x3xf32>
    %17 = arith.mulf %15, %16 : vector<2x3xf32>
    %18 = arith.addf %12, %17 : vector<2x3xf32>
    %c0_3 = arith.constant 0 : index
    %c0_4 = arith.constant 0 : index
    %19 = vector.load %arg2[%c0_3, %c0_4] : memref<1x3xf32, #tpu.memory_space<vmem>>, vector<1x3xf32>
    %20 = vector.broadcast %19 : vector<1x3xf32> to vector<2x3xf32>
    %21 = arith.addf %18, %20 : vector<2x3xf32>
    %c0_5 = arith.constant 0 : index
    %c0_6 = arith.constant 0 : index
    %22 = vector.load %arg3[%c0_5, %c0_6] : memref<2x3xf32, #tpu.memory_space<vmem>>, vector<2x3xf32>
    tpu.vector_store %arg3[%c0_5, %c0_6], %21 {strides = array<i32>} : memref<2x3xf32, #tpu.memory_space<vmem>>, vector<2x3xf32>,
    return
  }
}

</mosaic_0001>

<bundles_post_ra>
// kernel: tpu_custom_call.1
= control target key start
LH: loop header
LB: loop body
LE: loop exit
PB: predicated region body
PF: predicated region fallthrough
CT: control target
= control target key end

     0   :  { %8 = vsyncpa [#allocation3], 0  ;;  %s212_s0 = inlined_call_operand.hbm [shape: f32[2,3], index: 0, kind: input, shape index: {}]   ;;  %s213_s1 = inlined_call_operand.hbm [shape: f32[3,3], index: 1, kind: input, shape index: {}]   ;;  %s214_s2 = inlined_call_operand.vmem [shape: f32[1,3], index: 2, kind: input, shape index: {}]   ;;  %s215_s3 = inlined_call_operand.hbm [shape: f32[2,3], index: 3, kind: output, shape index: {}]  }
   0x1   :  { %9 = vsyncpa [#allocation6], 0 }
   0x2   :  { %10 = vsyncpa [#allocation4], 0  ;;  %s174_s12 = smov [#allocation2]   ;;  %s175_s14 = smov [#allocation5]  }
   0x3   :  { %s17_s13 = sshll.u32 %s174_s12, 4  ;;  %s27_s15 = sshll.u32 %s175_s14, 4  ;;  %s18_s13 = int_to_ptr.vmem [resolvable:$true] %s17_s13  ;;  %s28_s15 = int_to_ptr.vmem [resolvable:$true] %s27_s15 }
   0x4   :  { %s116_s16 = scalar_lea.vmem %s18_s13, 32  ;;  %p121_p1 = scmp.lt.s32.totalorder %s18_s13, %s18_s13 }
   0x5   :  { %p117_p0 = scmp.ne.s32.totalorder %s18_s13, %s116_s16  ;;  %p122_p2 = scmp.lt.s32.totalorder %s116_s16, %s116_s16 }
   0x7   :  { %p123_p3 = por %p122_p2, %p121_p1 }
   0x9   :  { %p124_p4 = pnand %p123_p3, %p117_p0 }
   0xb   :  { %127 = shalt.err (!%p124_p4)
}
   0xc   :  { %20 = dma.hbm_to_vmem [thread:$0]  %s212_s0, 32, %s18_s13, [#allocation3]  }
   0xd   :  { %s136_s19 = scalar_lea.vmem %s28_s15, 64  ;;  %p141_p6 = scmp.lt.s32.totalorder %s28_s15, %s28_s15 }
   0xe   :  { %p137_p5 = scmp.ne.s32.totalorder %s28_s15, %s136_s19  ;;  %p142_p7 = scmp.lt.s32.totalorder %s136_s19, %s136_s19 }
  0x10   :  { %p143_p8 = por %p142_p7, %p141_p6 }
  0x12   :  { %p144_p9 = pnand %p143_p8, %p137_p5 }
  0x14   :  { %147 = shalt.err (!%p144_p9)
}
  0x15   :  { %30 = dma.hbm_to_vmem [thread:$0]  %s213_s1, 64, %s28_s15, [#allocation6]  }
  0x16   :  { %168 = dma.done.wait [#allocation3], 32  }
  0x17   :  { %169 = vsyncadd [#allocation3], 4294967264 }
  0x18   :  { %170 = dma.done.wait [#allocation6], 64  }
  0x19   :  { %171 = vsyncadd [#allocation6], 4294967232  ;;  %v176_v0 = vmov 0   ;;  %v177_v1 = vmov 2   ;;  %v39_v2 = vld [vmem:[#allocation2] sm:$0x3]  ;;  %v46_v4 = vlaneseq }
  0x1a   :  { %104 = vset.pattern.permute.xlu0 %v176_v0  ;;  %106 = vset.pattern.permute.xlu1 %v177_v1  ;;  %v178_v3 = vmov 1   ;;  %v40_v9 = vld [vmem:[#allocation5] sm:$0x7]  ;;  %v97_v20 = vld [vmem:[%s214_s2] ss:$0 sm:$0xff]  ;;  %s179_s22 = smov [#allocation7]  }
  0x1b   :  { %43 = vperm.xlu0 %104, %v39_v2   ;;  %62 = vperm.xlu1 %106, %v39_v2   ;;  %v47_v5 = vshrl.u32 %v46_v4, 7  ;;  %s87_s23 = sshll.u32 %s179_s22, 4  ;;  %vm79_vm0 = vcmask 17408   ;;  %s88_s23 = int_to_ptr.vmem [resolvable:$true] %s87_s23 }
  0x1c   :  { %s148_s24 = scalar_lea.vmem %s88_s23, 32  ;;  %p153_p11 = scmp.lt.s32.totalorder %s88_s23, %s88_s23 }
  0x1d   :  { %v48_v6 = vsub.s32 0, %v47_v5  ;;  %v57_v7 = vsub.s32 1, %v47_v5  ;;  %v67_v8 = vsub.s32 2, %v47_v5  ;;  %p149_p10 = scmp.ne.s32.totalorder %s88_s23, %s148_s24  ;;  %p154_p12 = scmp.lt.s32.totalorder %s148_s24, %s148_s24 }
  0x1f   :  { %105 = vset.pattern.permute.xlu0 %v178_v3  ;;  %v49_v11 = vrot.slane %v40_v9, %v48_v6  ;;  %v58_v12 = vrot.slane %v40_v9, %v57_v7  ;;  %v68_v13 = vrot.slane %v40_v9, %v67_v8  ;;  %p155_p13 = por %p154_p12, %p153_p11 }
  0x20   :  { %52 = vperm.xlu0 %105, %v39_v2  }
  0x21   :  { %p156_p0 = pnand %p155_p13, %p149_p10 }
  0x24   :  { %107 = vset.pattern.permute.xlu0 %v177_v1 }
  0x96   :  { %v44_v10 = vpop.permute.xlu0 %43  ;;  %v63_v14 = vpop.permute.xlu1 %62 }
  0x97   :  { %v50_v16 = vmul.f32 %v49_v11, %v44_v10  ;;  %v69_v18 = vmul.f32 %v68_v13, %v63_v14 }
  0x9b   :  { %v53_v15 = vpop.permute.xlu0 %52 }
  0x9c   :  { %v59_v17 = vmul.f32 %v58_v12, %v53_v15 }
  0x9e   :  { %v60_v19 = vadd.f32 %v59_v17, %v50_v16 }
  0xa0   :  { %v70_v21 = vadd.f32 %v69_v18, %v60_v19 }
  0xa2   :  { %v78_v22 = vadd.f32 %v97_v20, %v70_v21 }
  0xa4   :  { %80 = vst.msk [vmem:[#allocation7] sm:$0x3] %vm79_vm0, %v78_v22 }
  0xa5   :  { %159 = shalt.err (!%p156_p0)
}
  0xa6   :  { %90 = dma.vmem_to_hbm [thread:$0]  %s88_s23, 32, %s215_s3, [#allocation4]  }
  0xa7   :  { %172 = dma.done.wait [#allocation4], 32  }
  0xa8   :  { %173 = vsyncadd [#allocation4], 4294967264 }
  0xa9   :  { %94 = vsyncpa [#allocation3], 1 }
  0xaa   :  { %95 = vsyncpa [#allocation6], 1 }
  0xab   :  { %96 = vsyncpa [#allocation4], 1 }

</bundles_post_ra>
